<compile_context>
chip_gen: v5e
topology: v5e:2x2
jax: 0.10.0
libtpu: 0.0.40
codegen_flags: <defaults>
</compile_context>

<pallas_src>
import functools

import jax
import jax.numpy as jnp
from jax.experimental import pallas as pl
from jax.experimental.pallas import tpu as pltpu


def _se_kernel(x_ref, w1t_ref, b1_ref, w2t_ref, b2_ref, o_ref, *, inv_hw):
    # x_ref / o_ref block: (TB, C, HW); weights/biases are full (untiled) blocks.
    x = x_ref[...]                                             # (TB, C, HW) native dtype

    # Global average pool with f32 accumulation only (no f32 copy of the block).
    pooled = jnp.sum(x, axis=2, dtype=jnp.float32) * inv_hw    # (TB, C) f32

    # 1x1 conv #1 (C -> mid) + ReLU. Batched over TB rows -> MXU sees M=TB.
    h = jnp.dot(pooled, w1t_ref[...],
                preferred_element_type=jnp.float32) + b1_ref[...]   # (TB, mid)
    h = jnp.maximum(h, 0.0)

    # 1x1 conv #2 (mid -> C) + Sigmoid.
    s = jnp.dot(h, w2t_ref[...],
                preferred_element_type=jnp.float32) + b2_ref[...]   # (TB, C)
    s = jax.nn.sigmoid(s)

    # Per-channel gate broadcast over spatial, in the input's native dtype
    # (bf16 inputs run the bulk multiply at packed VALU rate, half the VMEM).
    o_ref[...] = (x * s.astype(x.dtype)[:, :, None]).astype(o_ref.dtype)


def _chip_info():
    """Best-effort (physical VMEM bytes, has-two-TensorCores). Safe defaults."""
    vmem_phys = 64 << 20          # smallest of v5e/v6e (128 MiB) and v7x (64 MiB)
    multi_tc = False
    try:
        info = pltpu.get_tpu_info()
        vmem_phys = int(getattr(info, "vmem_capacity_bytes", vmem_phys))
    except Exception:
        pass
    try:
        kind = jax.devices()[0].device_kind.lower()
        multi_tc = ("v7" in kind) or ("7x" in kind)
    except Exception:
        pass
    return vmem_phys, multi_tc


def se_block(x, w1, b1, w2, b2, *, block_bytes_target=None, donate_x=False):
    """SEBlock forward (PyTorch SEBlock with use_conv=True).

    x  : (N, C, H, W) float32 or bfloat16  (NCHW, like PyTorch)
    w1 : (mid, C)  (conv1.weight[:, :, 0, 0])
    b1 : (mid,)
    w2 : (C, mid)  (conv2.weight[:, :, 0, 0])
    b2 : (C,)
    donate_x: set True only if the caller donates x; writes the gate in place.
    """
    n, c, h, w = x.shape
    hw = h * w
    mid = w1.shape[0]
    itemsize = x.dtype.itemsize

    # Flatten spatial dims (free reshape). A (TB, C, HW) block with full C and
    # full HW is a single contiguous HBM chunk, so no strided short-row DMAs.
    x_flat = x.reshape(n, c, hw)

    # ---- generation-aware tiling -------------------------------------------
    vmem_phys, multi_tc = _chip_info()
    safe_budget = (vmem_phys * 3) // 4                 # ~48 MiB v7x, ~96 MiB v5e/v6e
    if block_bytes_target is None:
        block_bytes_target = max(1 << 20, safe_budget // 6)   # ~8 MiB v7x, ~16 MiB v6e

    # VMEM footprint of one (1, C, HW) row: (sublane, lane) tile padding.
    lane = 128
    sub = 8 * max(1, 4 // itemsize)                    # 8 f32, 16 bf16, 32 int8
    c_vpad = -(-c // sub) * sub
    hw_vpad = -(-hw // lane) * lane
    row_vmem_bytes = c_vpad * hw_vpad * itemsize

    # Batch tile: biggest TB whose VMEM footprint is near the block target.
    tb = max(1, min(n, block_bytes_target // row_vmem_bytes))
    if multi_tc and n >= 2:
        # Two TensorCores: keep >= 2 grid steps, prefer an even step count.
        tb = min(tb, -(-n // 2))
        grid_n = -(-n // tb)
        if grid_n > 1 and grid_n % 2 == 1:
            tb = -(-n // (grid_n + 1))
    grid_n = -(-n // tb)                               # cdiv: tb need not divide N
    # (Ragged last block: OOB input rows are garbage but stay confined to
    #  their own batch rows, and the OOB output rows are never written.)

    # Parameters pre-transposed once in the wrapper; both dots are row-major
    # (TB,C)@(C,mid) and (TB,mid)@(mid,C) with no in-kernel relayouts.
    w1t = w1.T.astype(jnp.float32)                     # (C, mid)
    w2t = w2.T.astype(jnp.float32)                     # (mid, C)
    b1_2d = b1.reshape(1, mid).astype(jnp.float32)
    b2_2d = b2.reshape(1, c).astype(jnp.float32)

    # VMEM budget: double-buffered in + out blocks, params, headroom. Never
    # under-provision below the computed need; cap at physical VMEM.
    param_bytes = 4 * (2 * c * mid + mid + c)
    vmem_need = 4 * tb * row_vmem_bytes + 2 * param_bytes + (4 << 20)
    vmem_limit = int(min(max(vmem_need, 16 << 20), vmem_phys))
    # TODO(synk): for SE maps where a single (1, C, HW) row cannot fit in VMEM,
    # add a second 'arbitrary' grid axis over HW (two-pass pool + gate) instead
    # of relying on a large vmem_limit.

    # Advisory cost: HBM-bandwidth bound; real (unpadded) bytes.
    cost = pl.CostEstimate(
        flops=int(2 * n * c * hw + 4 * n * c * mid),
        transcendentals=int(n * c),
        bytes_accessed=int(2 * n * c * hw * itemsize + param_bytes),
    )

    kernel = functools.partial(_se_kernel, inv_hw=1.0 / hw)

    out_flat = pl.pallas_call(
        kernel,
        out_shape=jax.ShapeDtypeStruct((n, c, hw), x.dtype),
        grid_spec=pltpu.PrefetchScalarGridSpec(
            num_scalar_prefetch=0,
            grid=(grid_n,),
            in_specs=[
                # x batch tile; last two dims equal the full array dims, so the
                # (8,128) rule is satisfied even when HW % 128 != 0.
                pl.BlockSpec((tb, c, hw), lambda i: (i, 0, 0)),
                # Constant index maps: params fetched once, resident all grid.
                pl.BlockSpec((c, mid), lambda i: (0, 0)),      # W1^T
                pl.BlockSpec((1, mid), lambda i: (0, 0)),      # b1
                pl.BlockSpec((mid, c), lambda i: (0, 0)),      # W2^T
                pl.BlockSpec((1, c), lambda i: (0, 0)),        # b2
            ],
            out_specs=pl.BlockSpec((tb, c, hw), lambda i: (i, 0, 0)),
        ),
        compiler_params=pltpu.CompilerParams(
            dimension_semantics=("parallel",),
            vmem_limit_bytes=vmem_limit,
        ),
        cost_estimate=cost,
        input_output_aliases=({0: 0} if donate_x else {}),
    )(x_flat, w1t, b1_2d, w2t, b2_2d)

    return out_flat.reshape(n, c, h, w)


def se_block_ref(x, w1, b1, w2, b2):
    """Pure-JAX reference mirroring the PyTorch SEBlock (use_conv=True)."""
    xf = x.astype(jnp.float32)
    pooled = jnp.mean(xf, axis=(2, 3))                # (N, C)
    h = jnp.maximum(pooled @ w1.T + b1, 0.0)          # (N, mid)
    s = jax.nn.sigmoid(h @ w2.T + b2)                 # (N, C)
    return (xf * s[:, :, None, None]).astype(x.dtype)


if __name__ == "__main__":
    key = jax.random.PRNGKey(0)
    kx, k1, kb1, k2, kb2, kx2, kx3 = jax.random.split(key, 7)

    # SEBlock(channels=32, reduction=4) -> mid_channels = 8
    C, MID = 32, 8
    w1 = jax.random.normal(k1, (MID, C), dtype=jnp.float32) * 0.1   # conv1.weight[:, :, 0, 0]
    b1 = jax.random.normal(kb1, (MID,), dtype=jnp.float32) * 0.1    # conv1.bias
    w2 = jax.random.normal(k2, (C, MID), dtype=jnp.float32) * 0.1   # conv2.weight[:, :, 0, 0]
    b2 = jax.random.normal(kb2, (C,), dtype=jnp.float32) * 0.1      # conv2.bias

    # Case 1: lane-aligned HW (16*16 = 256), f32.
    N, H, W = 8, 16, 16
    x = jax.random.normal(kx, (N, C, H, W), dtype=jnp.float32)
    out = jax.block_until_ready(se_block(x, w1, b1, w2, b2))
    ref = se_block_ref(x, w1, b1, w2, b2)
    assert out.shape == (N, C, H, W)
    assert jnp.allclose(out, ref, atol=1e-5, rtol=1e-5), "mismatch (aligned HW)"

    # Case 2: HW = 49 (not a multiple of 128) -> no pad/slice passes, masked
    # lane stores only; DMA bytes are the minimal 2x.
    x2 = jax.random.normal(kx2, (4, C, 7, 7), dtype=jnp.float32)
    out2 = jax.block_until_ready(se_block(x2, w1, b1, w2, b2))
    ref2 = se_block_ref(x2, w1, b1, w2, b2)
    assert out2.shape == (4, C, 7, 7)
    assert jnp.allclose(out2, ref2, atol=1e-5, rtol=1e-5), "mismatch (HW=49)"

    # Case 3: batch that does not divide the tile (cdiv grid, ragged last
    # block); small block target forces TB=2 over N=5 on any chip generation.
    x3 = jax.random.normal(kx3, (5, C, 7, 7), dtype=jnp.float32)
    out3 = jax.block_until_ready(
        se_block(x3, w1, b1, w2, b2, block_bytes_target=32 * 1024))
    ref3 = se_block_ref(x3, w1, b1, w2, b2)
    assert out3.shape == (5, C, 7, 7)
    assert jnp.allclose(out3, ref3, atol=1e-5, rtol=1e-5), "mismatch (ragged batch)"

    # Case 4: bf16 input — bulk tensor stays bf16 (gate at native dtype),
    # pool/matmuls/sigmoid in f32.
    x4 = jax.random.normal(kx, (4, C, 16, 16), dtype=jnp.float32).astype(jnp.bfloat16)
    out4 = jax.block_until_ready(se_block(x4, w1, b1, w2, b2))
    ref4 = se_block_ref(x4, w1, b1, w2, b2)
    assert out4.dtype == jnp.bfloat16
    assert jnp.allclose(out4.astype(jnp.float32), ref4.astype(jnp.float32),
                        atol=3e-2, rtol=3e-2), "mismatch (bf16)"

    print("KERNEL_OK")
</pallas_src>

<mosaic_0001>
module attributes {stable_mosaic.version = 11 : i64} {
  func.func @_se_kernel(%arg0: i32, %arg1: memref<8x32x256xf32, #tpu.memory_space<vmem>>, %arg2: memref<32x8xf32, #tpu.memory_space<vmem>>, %arg3: memref<1x8xf32, #tpu.memory_space<vmem>>, %arg4: memref<8x32xf32, #tpu.memory_space<vmem>>, %arg5: memref<1x32xf32, #tpu.memory_space<vmem>>, %arg6: memref<8x32x256xf32, #tpu.memory_space<vmem>>) attributes {dimension_semantics = [#tpu.dimension_semantics<parallel>], iteration_bounds = array<i64: 1>, scalar_prefetch = 0 : i64, scratch_operands = 0 : i64, tpu.core_type = #tpu.core_type<tc>, window_params = [{transform_indices = @transform_0, window_bounds = array<i64: 8, 32, 256>}, {pipeline_mode = #tpu.pipeline_mode<synchronous>, transform_indices = @transform_1, window_bounds = array<i64: 32, 8>}, {pipeline_mode = #tpu.pipeline_mode<synchronous>, transform_indices = @transform_2, window_bounds = array<i64: 1, 8>}, {pipeline_mode = #tpu.pipeline_mode<synchronous>, transform_indices = @transform_3, window_bounds = array<i64: 8, 32>}, {pipeline_mode = #tpu.pipeline_mode<synchronous>, transform_indices = @transform_4, window_bounds = array<i64: 1, 32>}, {transform_indices = @transform_5, window_bounds = array<i64: 8, 32, 256>}]} {
    %c0 = arith.constant 0 : index
    %c0_0 = arith.constant 0 : index
    %c0_1 = arith.constant 0 : index
    %0 = vector.load %arg1[%c0, %c0_0, %c0_1] : memref<8x32x256xf32, #tpu.memory_space<vmem>>, vector<8x32x256xf32>
    %cst = arith.constant dense<0.000000e+00> : vector<8x32xf32>
    %1 = vector.multi_reduction <add>, %0, %cst [2] : vector<8x32x256xf32> to vector<8x32xf32>
    %cst_2 = arith.constant 3.906250e-03 : f32
    %2 = vector.broadcast %cst_2 : f32 to vector<8x32xf32>
    %3 = arith.mulf %1, %2 : vector<8x32xf32>
    %c0_3 = arith.constant 0 : index
    %c0_4 = arith.constant 0 : index
    %4 = vector.load %arg2[%c0_3, %c0_4] : memref<32x8xf32, #tpu.memory_space<vmem>>, vector<32x8xf32>
    %cst_5 = arith.constant dense<0.000000e+00> : vector<8x8xf32>
    %5 = tpu.matmul %3, %4, %cst_5 {dimension_numbers = #tpu.dot_dimension_numbers<[1], [0], [0], [1], [0, 0, 1, 1], [], []>} : vector<8x32xf32>, vector<32x8xf32>, vector<8x8xf32> -> vector<8x8xf32>
    %c0_6 = arith.constant 0 : index
    %c0_7 = arith.constant 0 : index
    %6 = vector.load %arg3[%c0_6, %c0_7] : memref<1x8xf32, #tpu.memory_space<vmem>>, vector<1x8xf32>
    %7 = vector.broadcast %6 : vector<1x8xf32> to vector<8x8xf32>
    %8 = arith.addf %5, %7 : vector<8x8xf32>
    %cst_8 = arith.constant 0.000000e+00 : f32
    %9 = vector.broadcast %cst_8 : f32 to vector<8x8xf32>
    %10 = arith.maximumf %8, %9 : vector<8x8xf32>
    %c0_9 = arith.constant 0 : index
    %c0_10 = arith.constant 0 : index
    %11 = vector.load %arg4[%c0_9, %c0_10] : memref<8x32xf32, #tpu.memory_space<vmem>>, vector<8x32xf32>
    %cst_11 = arith.constant dense<0.000000e+00> : vector<8x32xf32>
    %12 = tpu.matmul %10, %11, %cst_11 {dimension_numbers = #tpu.dot_dimension_numbers<[1], [0], [0], [1], [0, 0, 1, 1], [], []>} : vector<8x8xf32>, vector<8x32xf32>, vector<8x32xf32> -> vector<8x32xf32>
    %c0_12 = arith.constant 0 : index
    %c0_13 = arith.constant 0 : index
    %13 = vector.load %arg5[%c0_12, %c0_13] : memref<1x32xf32, #tpu.memory_space<vmem>>, vector<1x32xf32>
    %14 = vector.broadcast %13 : vector<1x32xf32> to vector<8x32xf32>
    %15 = arith.addf %12, %14 : vector<8x32xf32>
    %16 = arith.negf %15 : vector<8x32xf32>
    %17 = math.exp %16 : vector<8x32xf32>
    %cst_14 = arith.constant 1.000000e+00 : f32
    %18 = vector.broadcast %cst_14 : f32 to vector<8x32xf32>
    %19 = arith.addf %18, %17 : vector<8x32xf32>
    %20 = arith.divf %18, %19 : vector<8x32xf32>
    %21 = vector.shape_cast %20 : vector<8x32xf32> to vector<8x32x1xf32>
    %22 = vector.broadcast %21 : vector<8x32x1xf32> to vector<8x32x256xf32>
    %23 = arith.mulf %0, %22 : vector<8x32x256xf32>
    %c0_15 = arith.constant 0 : index
    %c0_16 = arith.constant 0 : index
    %c0_17 = arith.constant 0 : index
    %24 = vector.load %arg6[%c0_15, %c0_16, %c0_17] : memref<8x32x256xf32, #tpu.memory_space<vmem>>, vector<8x32x256xf32>
    tpu.vector_store %arg6[%c0_15, %c0_16, %c0_17], %23 {strides = array<i32>} : memref<8x32x256xf32, #tpu.memory_space<vmem>>, vector<8x32x256xf32>,
    return
  }
  func.func @transform_0(%arg0: i32) -> (i32, i32, i32) {
    %c0_i32 = arith.constant 0 : i32
    %c0_i32_0 = arith.constant 0 : i32
    %c0_i32_1 = arith.constant 0 : i32
    return %arg0, %c0_i32, %c0_i32_0 : i32, i32, i32
  }
  func.func @transform_1(%arg0: i32) -> (i32, i32) {
    %c0_i32 = arith.constant 0 : i32
    %c0_i32_0 = arith.constant 0 : i32
    %c0_i32_1 = arith.constant 0 : i32
    return %c0_i32, %c0_i32_0 : i32, i32
  }
  func.func @transform_2(%arg0: i32) -> (i32, i32) {
    %c0_i32 = arith.constant 0 : i32
    %c0_i32_0 = arith.constant 0 : i32
    %c0_i32_1 = arith.constant 0 : i32
    return %c0_i32, %c0_i32_0 : i32, i32
  }
  func.func @transform_3(%arg0: i32) -> (i32, i32) {
    %c0_i32 = arith.constant 0 : i32
    %c0_i32_0 = arith.constant 0 : i32
    %c0_i32_1 = arith.constant 0 : i32
    return %c0_i32, %c0_i32_0 : i32, i32
  }
  func.func @transform_4(%arg0: i32) -> (i32, i32) {
    %c0_i32 = arith.constant 0 : i32
    %c0_i32_0 = arith.constant 0 : i32
    %c0_i32_1 = arith.constant 0 : i32
    return %c0_i32, %c0_i32_0 : i32, i32
  }
  func.func @transform_5(%arg0: i32) -> (i32, i32, i32) {
    %c0_i32 = arith.constant 0 : i32
    %c0_i32_0 = arith.constant 0 : i32
    %c0_i32_1 = arith.constant 0 : i32
    return %arg0, %c0_i32, %c0_i32_0 : i32, i32, i32
  }
}

</mosaic_0001>

<bundles_post_ra>
// kernel: tpu_custom_call.1
= control target key start
LH: loop header
LB: loop body
LE: loop exit
PB: predicated region body
PF: predicated region fallthrough
CT: control target
= control target key end

     0   :  { %10 = vsyncpa [#allocation3], 0  ;;  %s1328_s0 = inlined_call_operand.hbm [shape: f32[8,32,256], index: 0, kind: input, shape index: {}]   ;;  %s1329_s1 = inlined_call_operand.vmem [shape: f32[32,8], index: 1, kind: input, shape index: {}]   ;;  %s1330_s2 = inlined_call_operand.vmem [shape: f32[1,8], index: 2, kind: input, shape index: {}]   ;;  %s1331_s3 = inlined_call_operand.vmem [shape: f32[8,32], index: 3, kind: input, shape index: {}]   ;;  %s1332_s4 = inlined_call_operand.vmem [shape: f32[1,32], index: 4, kind: input, shape index: {}]   ;;  %s1333_s5 = inlined_call_operand.hbm [shape: f32[8,32,256], index: 5, kind: output, shape index: {}]  }
   0x1   :  { %11 = vsyncpa [#allocation4], 0  ;;  %s16_s20 = sshll.u32 %s1328_s0, 4  ;;  %s864_s21 = smov [#allocation2]   ;;  %s17_s20 = int_to_ptr.hbm [resolvable:$true] %s16_s20 }
   0x2   :  { %s18_s22 = sshll.u32 %s864_s21, 4  ;;  %s865_s23 = smov 256   ;;  %s19_s22 = int_to_ptr.vmem [resolvable:$true] %s18_s22 }
   0x3   :  { %s866_s24 = smov 16  }
   0x4   :  { %24 = dma.hbm_to_vmem [thread:$0]  %s17_s20, 8192, %s19_s22, [#allocation3], %s865_s23, %s865_s23, %s866_s24  }
   0x5   :  { %860 = dma.done.wait [#allocation3], 8192  }
   0x6   :  { %861 = vsyncadd [#allocation3], 4294959104  ;;  %v904_v0 = vld [vmem:[#allocation2 + $0x40] sm:$0xff]  ;;  %v906_v1 = vld [vmem:[#allocation2 + $0x48] sm:$0xff]  ;;  %vm274_vm0 = vcmask 130112   ;;  %vm278_vm1 = vcmask 195712  }
   0x7   :  { %v908_v2 = vld [vmem:[#allocation2 + $0x20] sm:$0xff]  ;;  %v113_v3 = vadd.f32 %v906_v1, %v904_v0  ;;  %v912_v4 = vld [vmem:[#allocation2 + $0x28] sm:$0xff]  ;;  %v922_v9 = vld [vmem:[#allocation2 + $0x50] sm:$0xff]  ;;  %vm282_vm2 = vcmask 261312   ;;  %vm333_vm3 = vcmask 1041409   ;;  %vm335_vm4 = vcmask 1042434  }
   0x8   :  { %v914_v5 = vld [vmem:[#allocation2] sm:$0xff]  ;;  %v916_v6 = vld [vmem:[#allocation2 + $0x8] sm:$0xff]  ;;  %v107_v7 = vadd.f32 %v912_v4, %v908_v2  ;;  %v924_v10 = vld [vmem:[#allocation2 + $0x58] sm:$0xff]  ;;  %vm337_vm5 = vcmask 1043459   ;;  %vm339_vm6 = vcmask 1044484   ;;  %vm341_vm7 = vcmask 1045509  }
   0x9   :  { %v101_v8 = vadd.f32 %v916_v6, %v914_v5  ;;  %114 = vadd.xlane.f32.xlu1 %v113_v3  ;;  %v926_v11 = vld [vmem:[#allocation2 + $0x60] sm:$0xff]  ;;  %v928_v12 = vld [vmem:[#allocation2 + $0x68] sm:$0xff]  ;;  %v930_v13 = vld [vmem:[#allocation2 + $0x10] sm:$0xff]  ;;  %v116_v15 = vadd.f32 %v924_v10, %v922_v9  ;;  %vm343_vm8 = vcmask 1046534   ;;  %vm345_vm9 = vcmask 1047559   ;;  %s753_s13 = sshll.u32 %s1333_s5, 4  ;;  %s754_s13 = int_to_ptr.hbm [resolvable:$true] %s753_s13 }
   0xa   :  { %108 = vadd.xlane.f32.xlu2 %v107_v7  ;;  %v932_v14 = vld [vmem:[#allocation2 + $0x18] sm:$0xff]  ;;  %v119_v16 = vadd.f32 %v928_v12, %v926_v11  ;;  %v940_v18 = vld [vmem:[#allocation2 + $0x90] sm:$0xff]  ;;  %v948_v22 = vld [vmem:[#allocation2 + $0x80] sm:$0xff]  ;;  %vm347_vm10 = vcmask 261120   ;;  %vm376_vm11 = vcmask 64512  }
   0xb   :  { %102 = vadd.xlane.f32.xlu0 %v101_v8  ;;  %v104_v17 = vadd.f32 %v932_v14, %v930_v13  ;;  %v942_v19 = vld [vmem:[#allocation2 + $0x98] sm:$0xff]  ;;  %v944_v20 = vld [vmem:[#allocation2 + $0x30] sm:$0xff]  ;;  %v950_v23 = vld [vmem:[#allocation2 + $0x88] sm:$0xff] }
   0xc   :  { %v946_v21 = vld [vmem:[#allocation2 + $0x38] sm:$0xff]  ;;  %v128_v24 = vadd.f32 %v942_v19, %v940_v18  ;;  %v125_v26 = vadd.f32 %v950_v23, %v948_v22  ;;  %v958_v27 = vld [vmem:[#allocation2 + $0xa0] sm:$0xff]  ;;  %v960_v28 = vld [vmem:[#allocation2 + $0xa8] sm:$0xff] }
   0xd   :  { %v110_v25 = vadd.f32 %v946_v21, %v944_v20  ;;  %v962_v29 = vld [vmem:[#allocation2 + $0xc0] sm:$0xff]  ;;  %v964_v30 = vld [vmem:[#allocation2 + $0xc8] sm:$0xff]  ;;  %v966_v31 = vld [vmem:[#allocation2 + $0x70] sm:$0xff]  ;;  %v131_v33 = vadd.f32 %v960_v28, %v958_v27 }
   0xe   :  { %1374 = vst [vmem:[#allocation8_spill] sm:$0xff] %v962_v29  ;;  %v968_v32 = vld [vmem:[#allocation2 + $0x78] sm:$0xff]  ;;  %v137_v34 = vadd.f32 %v964_v30, %v962_v29  ;;  %v976_v36 = vld [vmem:[#allocation2 + $0xb0] sm:$0xff]  ;;  %v980_v38 = vld [vmem:[#allocation2 + $0xe0] sm:$0xff] }
   0xf   :  { %1375 = vst [vmem:[#allocation9_spill] sm:$0xff] %v964_v30  ;;  %v122_v35 = vadd.f32 %v968_v32, %v966_v31  ;;  %v978_v37 = vld [vmem:[#allocation2 + $0xb8] sm:$0xff]  ;;  %v982_v39 = vld [vmem:[#allocation2 + $0xe8] sm:$0xff]  ;;  %v984_v40 = vld [vmem:[#allocation2 + $0xd0] sm:$0xff] }
  0x10   :  { %1376 = vst [vmem:[#allocation10_spill] sm:$0xff] %v976_v36  ;;  %v986_v41 = vld [vmem:[#allocation2 + $0xd8] sm:$0xff]  ;;  %v134_v42 = vadd.f32 %v978_v37, %v976_v36  ;;  %v143_v43 = vadd.f32 %v982_v39, %v980_v38  ;;  %v994_v45 = vld [vmem:[#allocation2 + $0x110] sm:$0xff]  ;;  %v1002_v49 = vld [vmem:[#allocation2 + $0x100] sm:$0xff] }
  0x11   :  { %117 = vadd.xlane.f32.xlu1 %v116_v15  ;;  %1377 = vst [vmem:[#allocation11_spill] sm:$0xff] %v978_v37  ;;  %v140_v44 = vadd.f32 %v986_v41, %v984_v40  ;;  %v996_v46 = vld [vmem:[#allocation2 + $0x118] sm:$0xff]  ;;  %v998_v47 = vld [vmem:[#allocation2 + $0xf0] sm:$0xff]  ;;  %v1004_v50 = vld [vmem:[#allocation2 + $0x108] sm:$0xff] }
  0x12   :  { %120 = vadd.xlane.f32.xlu2 %v119_v16  ;;  %1378 = vst [vmem:[#allocation12_spill] sm:$0xff] %v980_v38  ;;  %v1000_v48 = vld [vmem:[#allocation2 + $0xf8] sm:$0xff]  ;;  %v152_v51 = vadd.f32 %v996_v46, %v994_v45  ;;  %v149_v53 = vadd.f32 %v1004_v50, %v1002_v49  ;;  %v1012_v54 = vld [vmem:[#allocation2 + $0x140] sm:$0xff]  ;;  %v1014_v55 = vld [vmem:[#allocation2 + $0x148] sm:$0xff] }
  0x13   :  { %105 = vadd.xlane.f32.xlu0 %v104_v17  ;;  %1379 = vst [vmem:[#allocation13_spill] sm:$0xff] %v982_v39  ;;  %v146_v52 = vadd.f32 %v1000_v48, %v998_v47  ;;  %v1016_v56 = vld [vmem:[#allocation2 + $0x150] sm:$0xff]  ;;  %v1018_v57 = vld [vmem:[#allocation2 + $0x158] sm:$0xff]  ;;  %v1020_v58 = vld [vmem:[#allocation2 + $0x120] sm:$0xff]  ;;  %v161_v60 = vadd.f32 %v1014_v55, %v1012_v54 }
  0x14   :  { %1380 = vst [vmem:[#allocation14_spill] sm:$0xff] %v994_v45  ;;  %v1022_v59 = vld [vmem:[#allocation2 + $0x128] sm:$0xff]  ;;  %v164_v61 = vadd.f32 %v1018_v57, %v1016_v56  ;;  %v1030_v63 = vld [vmem:[#allocation2 + $0x160] sm:$0xff]  ;;  %v1038_v15 = vld [vmem:[#allocation2 + $0x130] sm:$0xff] }
  0x15   :  { %1381 = vst [vmem:[#allocation15_spill] sm:$0xff] %v996_v46  ;;  %v155_v62 = vadd.f32 %v1022_v59, %v1020_v58  ;;  %v1032_v3 = vld [vmem:[#allocation2 + $0x168] sm:$0xff]  ;;  %v1034_v7 = vld [vmem:[#allocation2 + $0x180] sm:$0xff]  ;;  %v1040_v16 = vld [vmem:[#allocation2 + $0x138] sm:$0xff] }
  0x16   :  { %1382 = vst [vmem:[#allocation16_spill] sm:$0xff] %v998_v47  ;;  %v1036_v8 = vld [vmem:[#allocation2 + $0x188] sm:$0xff]  ;;  %v167_v17 = vadd.f32 %v1032_v3, %v1030_v63 }
  0x17   :  { %1383 = vst [vmem:[#allocation17_spill] sm:$0xff] %v1000_v48 }
  0x18   :  { %1384 = vst [vmem:[#allocation18_spill] sm:$0xff] %v1002_v49 }
  0x19   :  { %129 = vadd.xlane.f32.xlu1 %v128_v24  ;;  %1385 = vst [vmem:[#allocation19_spill] sm:$0xff] %v1004_v50  ;;  %v173_v24 = vadd.f32 %v1036_v8, %v1034_v7 }
  0x1a   :  { %111 = vadd.xlane.f32.xlu2 %v110_v25  ;;  %1386 = vst [vmem:[#allocation20_spill] sm:$0xff] %v1012_v54  ;;  %v158_v25 = vadd.f32 %v1040_v16, %v1038_v15 }
  0x1b   :  { %126 = vadd.xlane.f32.xlu0 %v125_v26  ;;  %1387 = vst [vmem:[#allocation21_spill] sm:$0xff] %v1014_v55  ;;  %v1048_v26 = vld [vmem:[#allocation2 + $0x170] sm:$0xff] }
  0x1c   :  { %1388 = vst [vmem:[#allocation22_spill] sm:$0xff] %v1016_v56 }
  0x1d   :  { %1389 = vst [vmem:[#allocation23_spill] sm:$0xff] %v1018_v57 }
  0x1e   :  { %1390 = vst [vmem:[#allocation24_spill] sm:$0xff] %v1022_v59 }
  0x1f   :  { %1391 = vst [vmem:[#allocation25_spill] sm:$0xff] %v1030_v63 }
  0x20   :  { %1392 = vst [vmem:[#allocation26_spill] sm:$0xff] %v1032_v3 }
  0x21   :  { %132 = vadd.xlane.f32.xlu1 %v131_v33  ;;  %1393 = vst [vmem:[#allocation27_spill] sm:$0xff] %v1034_v7  ;;  %v1050_v33 = vld [vmem:[#allocation2 + $0x178] sm:$0xff] }
  0x22   :  { %138 = vadd.xlane.f32.xlu2 %v137_v34  ;;  %1394 = vst [vmem:[#allocation28_spill] sm:$0xff] %v1036_v8  ;;  %v1052_v34 = vld [vmem:[#allocation2 + $0x1a0] sm:$0xff] }
  0x23   :  { %123 = vadd.xlane.f32.xlu0 %v122_v35  ;;  %1395 = vst [vmem:[#allocation29_spill] sm:$0xff] %v1038_v15  ;;  %v1054_v35 = vld [vmem:[#allocation2 + $0x1a8] sm:$0xff] }
  0x24   :  { %1396 = vst [vmem:[#allocation30_spill] sm:$0xff] %v1040_v16 }
  0x25   :  { %1397 = vst [vmem:[#allocation31_spill] sm:$0xff] %v1048_v26 }
  0x26   :  { %1398 = vst [vmem:[#allocation32_spill] sm:$0xff] %v1050_v33 }
  0x27   :  { %1399 = vst [vmem:[#allocation33_spill] sm:$0xff] %v1052_v34 }
  0x28   :  { %1400 = vst [vmem:[#allocation34_spill] sm:$0xff] %v1054_v35 }
  0x29   :  { %135 = vadd.xlane.f32.xlu1 %v134_v42  ;;  %v1056_v42 = vld [vmem:[#allocation2 + $0x190] sm:$0xff] }
  0x2a   :  { %144 = vadd.xlane.f32.xlu2 %v143_v43  ;;  %1401 = vst [vmem:[#allocation35_spill] sm:$0xff] %v1056_v42  ;;  %v1058_v43 = vld [vmem:[#allocation2 + $0x198] sm:$0xff] }
  0x2b   :  { %141 = vadd.xlane.f32.xlu0 %v140_v44  ;;  %1402 = vst [vmem:[#allocation36_spill] sm:$0xff] %v1058_v43  ;;  %v170_v44 = vadd.f32 %v1050_v33, %v1048_v26 }
  0x31   :  { %153 = vadd.xlane.f32.xlu1 %v152_v51  ;;  %v179_v51 = vadd.f32 %v1054_v35, %v1052_v34  ;;  %v1086_v35 = vld [vmem:[#allocation2 + $0x1f8] sm:$0xff]  ;;  %v1088_v34 = vld [vmem:[#allocation2 + $0x1e0] sm:$0xff] }
  0x32   :  { %147 = vadd.xlane.f32.xlu2 %v146_v52  ;;  %v176_v52 = vadd.f32 %v1058_v43, %v1056_v42  ;;  %1410 = vst [vmem:[#allocation44_spill] sm:$0xff] %v1086_v35  ;;  %v1090_v43 = vld [vmem:[#allocation2 + $0x1e8] sm:$0xff] }
  0x33   :  { %150 = vadd.xlane.f32.xlu0 %v149_v53  ;;  %v1066_v53 = vld [vmem:[#allocation2 + $0x1d0] sm:$0xff]  ;;  %1411 = vst [vmem:[#allocation45_spill] sm:$0xff] %v1088_v34 }
  0x34   :  { %1403 = vst [vmem:[#allocation37_spill] sm:$0xff] %v1066_v53 }
  0x35   :  { %1412 = vst [vmem:[#allocation46_spill] sm:$0xff] %v1090_v43 }
  0x39   :  { %162 = vadd.xlane.f32.xlu1 %v161_v60  ;;  %v1068_v60 = vld [vmem:[#allocation2 + $0x1d8] sm:$0xff] }
  0x3a   :  { %165 = vadd.xlane.f32.xlu2 %v164_v61  ;;  %1404 = vst [vmem:[#allocation38_spill] sm:$0xff] %v1068_v60  ;;  %v1070_v61 = vld [vmem:[#allocation2 + $0x1b0] sm:$0xff] }
  0x3b   :  { %156 = vadd.xlane.f32.xlu0 %v155_v62  ;;  %1405 = vst [vmem:[#allocation39_spill] sm:$0xff] %v1070_v61  ;;  %v1072_v62 = vld [vmem:[#allocation2 + $0x1b8] sm:$0xff] }
  0x3c   :  { %1406 = vst [vmem:[#allocation40_spill] sm:$0xff] %v1072_v62 }
  0x41   :  { %168 = vadd.xlane.f32.xlu1 %v167_v17  ;;  %v1074_v17 = vld [vmem:[#allocation2 + $0x1c0] sm:$0xff] }
  0x42   :  { %174 = vadd.xlane.f32.xlu2 %v173_v24  ;;  %1407 = vst [vmem:[#allocation41_spill] sm:$0xff] %v1074_v17  ;;  %v1076_v24 = vld [vmem:[#allocation2 + $0x1c8] sm:$0xff] }
  0x43   :  { %159 = vadd.xlane.f32.xlu0 %v158_v25  ;;  %1408 = vst [vmem:[#allocation42_spill] sm:$0xff] %v1076_v24  ;;  %v188_v25 = vadd.f32 %v1068_v60, %v1066_v53  ;;  %v191_v53 = vadd.f32 %v1090_v43, %v1088_v34 }
  0x49   :  { %171 = vadd.xlane.f32.xlu1 %v170_v44  ;;  %v182_v44 = vadd.f32 %v1072_v62, %v1070_v61 }
  0x4a   :  { %180 = vadd.xlane.f32.xlu2 %v179_v51  ;;  %v185_v51 = vadd.f32 %v1076_v24, %v1074_v17 }
  0x4b   :  { %177 = vadd.xlane.f32.xlu0 %v176_v52  ;;  %v1084_v52 = vld [vmem:[#allocation2 + $0x1f0] sm:$0xff] }
  0x4c   :  { %1409 = vst [vmem:[#allocation43_spill] sm:$0xff] %v1084_v52  ;;  %v194_v60 = vadd.f32 %v1086_v35, %v1084_v52 }
  0x51   :  { %189 = vadd.xlane.f32.xlu1 %v188_v25  ;;  %v1350_v25 = vlaneseq }
  0x52   :  { %183 = vadd.xlane.f32.xlu2 %v182_v44 }
  0x53   :  { %186 = vadd.xlane.f32.xlu0 %v185_v51  ;;  %v1097_v61 = vand.u32 127, %v1350_v25 }
  0x55   :  { %v1100_v8 = vadd.s32 4294967280, %v1097_v61  ;;  %v1103_v3 = vadd.s32 4294967288, %v1097_v61 }
  0x59   :  { %195 = vadd.xlane.f32.xlu1 %v194_v60 }
  0x5b   :  { %192 = vadd.xlane.f32.xlu0 %v191_v53 }
  0x7c   :  { %v115_v62 = vpop.xlane.xlu1 %114 }
  0x7d   :  { %v109_v44 = vpop.xlane.xlu2 %108  ;;  %v201_v42 = vmul.f32 0.00390625, %v115_v62 }
  0x7e   :  { %v103_v51 = vpop.xlane.xlu0 %102  ;;  %v199_v7 = vmul.f32 0.00390625, %v109_v44 }
  0x7f   :  { %v197_v35 = vmul.f32 0.00390625, %v103_v51  ;;  %v284_v63 = vperm.slane %v201_v42, %v1097_v61  ;;  %v1114_v42 = vadd.s32 4294967272, %v1097_v61 }
  0x80   :  { %v277_v25 = vperm.slane %v199_v7, %v1100_v8 }
  0x81   :  { %v271_v57 = vperm.slane %v197_v35, %v1097_v61 }
  0x84   :  { %v118_v52 = vpop.xlane.xlu1 %117 }
  0x85   :  { %v202_v43 = vmul.f32 0.00390625, %v118_v52  ;;  %v121_v60 = vpop.xlane.xlu2 %120 }
  0x86   :  { %v106_v53 = vpop.xlane.xlu0 %105  ;;  %v203_v16 = vmul.f32 0.00390625, %v121_v60 }
  0x87   :  { %v198_v34 = vmul.f32 0.00390625, %v106_v53  ;;  %v285_v62 = vperm.slane %v202_v43, %v1103_v3 }
  0x88   :  { %v287_v35 = vperm.slane %v203_v16, %v1100_v8 }
  0x89   :  { %v273_v44 = vperm.slane %v198_v34, %v1103_v3  ;;  %v286_v56 = vsel %vm274_vm0, %v285_v62, %v284_v63 }
  0x8b   :  { %v275_v51 = vsel %vm274_vm0, %v273_v44, %v271_v57 }
  0x8c   :  { %v279_v52 = vsel %vm278_vm1, %v277_v25, %v275_v51  ;;  %v130_v55 = vpop.xlane.xlu1 %129  ;;  %v288_v25 = vsel %vm278_vm1, %v287_v35, %v286_v56  ;;  %v231_v56 = vld [vmem:[%s1329_s1 + $0x10] sm:$0xff]  ;;  %v229_v35 = vld [vmem:[%s1329_s1] sm:$0xff] }
  0x8d   :  { %v112_v54 = vpop.xlane.xlu2 %111 }
  0x8e   :  { %v127_v53 = vpop.xlane.xlu0 %126  ;;  %v200_v7 = vmul.f32 0.00390625, %v112_v54 }
  0x90   :  { %v281_v34 = vperm.slane %v200_v7, %v1114_v42 }
  0x92   :  { %v283_v60 = vsel %vm282_vm2, %v281_v34, %v279_v52  ;;  %v230_v52 = vld [vmem:[%s1329_s1 + $0x8] sm:$0xff] }
  0x94   :  { %v133_v43 = vpop.xlane.xlu1 %132 }
  0x95   :  { %v139_v15 = vpop.xlane.xlu2 %138  ;;  %v207_v33 = vmul.f32 0.00390625, %v133_v43 }
  0x96   :  { %v124_v46 = vpop.xlane.xlu0 %123  ;;  %v209_v17 = vmul.f32 0.00390625, %v139_v15 }
  0x97   :  { %v204_v63 = vmul.f32 0.00390625, %v124_v46 }
  0x98   :  { %v298_v26 = vperm.slane %v209_v17, %v1097_v61 }
  0x99   :  { %v289_v57 = vperm.slane %v204_v63, %v1114_v42  ;;  %v232_v63 = vld [vmem:[%s1329_s1 + $0x18] sm:$0xff] }
  0x9a   :  { %362 = vmatpush.msra.mxu0 %v232_v63 }
  0x9b   :  { %v290_v62 = vsel %vm282_vm2, %v289_v57, %v288_v25 }
  0x9c   :  { %v1122_v44 = vsel %vm333_vm3, %v290_v62, %v283_v60  ;;  %v136_v54 = vpop.xlane.xlu1 %135  ;;  %363 = vmatpush.msra.mxu0 %v231_v56  ;;  %v206_v60 = vmul.f32 0.00390625, %v130_v55  ;;  %v205_v62 = vmul.f32 0.00390625, %v127_v53 }
  0x9d   :  { %v145_v51 = vpop.xlane.xlu2 %144  ;;  %v208_v30 = vmul.f32 0.00390625, %v136_v54 }
  0x9e   :  { %v142_v16 = vpop.xlane.xlu0 %141  ;;  %364 = vmatpush.msra.mxu0 %v230_v52  ;;  %v292_v39 = vperm.slane %v206_v60, %v1103_v3  ;;  %v291_v38 = vperm.slane %v205_v62, %v1097_v61  ;;  %v211_v52 = vmul.f32 0.00390625, %v145_v51 }
  0x9f   :  { %v210_v48 = vmul.f32 0.00390625, %v142_v16  ;;  %v294_v16 = vperm.slane %v207_v33, %v1100_v8  ;;  %v296_v43 = vperm.slane %v208_v30, %v1114_v42 }
  0xa0   :  { %365 = vmatpush.msra.mxu0 %v229_v35  ;;  %v293_v55 = vsel %vm274_vm0, %v292_v39, %v291_v38  ;;  %v301_v17 = vperm.slane %v211_v52, %v1100_v8 }
  0xa1   :  { %v299_v35 = vperm.slane %v210_v48, %v1103_v3  ;;  %v295_v52 = vsel %vm278_vm1, %v294_v16, %v293_v55 }
  0xa3   :  { %v300_v54 = vsel %vm274_vm0, %v299_v35, %v298_v26 }
  0xa4   :  { %v154_v45 = vpop.xlane.xlu1 %153 }
  0xa5   :  { %v148_v50 = vpop.xlane.xlu2 %147  ;;  %v214_v29 = vmul.f32 0.00390625, %v154_v45 }
  0xa6   :  { %v151_v49 = vpop.xlane.xlu0 %150  ;;  %v212_v37 = vmul.f32 0.00390625, %v148_v50 }
  0xa7   :  { %v213_v15 = vmul.f32 0.00390625, %v151_v49  ;;  %v306_v38 = vperm.slane %v214_v29, %v1103_v3 }
  0xa8   :  { %v303_v39 = vperm.slane %v212_v37, %v1114_v42 }
  0xa9   :  { %v305_v51 = vperm.slane %v213_v15, %v1097_v61 }
  0xab   :  { %v307_v55 = vsel %vm274_vm0, %v306_v38, %v305_v51 }
  0xac   :  { %v163_v7 = vpop.xlane.xlu1 %162 }
  0xad   :  { %v166_v46 = vpop.xlane.xlu2 %165  ;;  %v217_v53 = vmul.f32 0.00390625, %v163_v7 }
  0xae   :  { %v157_v24 = vpop.xlane.xlu0 %156  ;;  %v218_v36 = vmul.f32 0.00390625, %v166_v46 }
  0xaf   :  { %v215_v45 = vmul.f32 0.00390625, %v157_v24  ;;  %v312_v7 = vperm.slane %v217_v53, %v1097_v61 }
  0xb1   :  { %v308_v29 = vperm.slane %v215_v45, %v1100_v8 }
  0xb4   :  { %v169_v34 = vpop.xlane.xlu1 %168 }
  0xb5   :  { %v175_v57 = vpop.xlane.xlu2 %174  ;;  %v219_v49 = vmul.f32 0.00390625, %v169_v34 }
  0xb6   :  { %v160_v25 = vpop.xlane.xlu0 %159  ;;  %v221_v60 = vmul.f32 0.00390625, %v175_v57  ;;  %v313_v57 = vperm.slane %v218_v36, %v1103_v3  ;;  %v297_v36 = vsel %vm282_vm2, %v296_v43, %v295_v52  ;;  %v806_v52 = vld [vmem:[%s1330_s2] ss:$0 sm:$0xff] }
  0xb7   :  { %v216_v33 = vmul.f32 0.00390625, %v160_v25  ;;  %v302_v25 = vsel %vm278_vm1, %v301_v17, %v300_v54  ;;  %v315_v35 = vperm.slane %v219_v49, %v1100_v8  ;;  %v309_v17 = vsel %vm278_vm1, %v308_v29, %v307_v55 }
  0xb8   :  { %v319_v26 = vperm.slane %v221_v60, %v1097_v61  ;;  %v314_v53 = vsel %vm274_vm0, %v313_v57, %v312_v7 }
  0xb9   :  { %v316_v38 = vsel %vm278_vm1, %v315_v35, %v314_v53 }
  0xbc   :  { %v172_v63 = vpop.xlane.xlu1 %171 }
  0xbd   :  { %v181_v47 = vpop.xlane.xlu2 %180  ;;  %v220_v46 = vmul.f32 0.00390625, %v172_v63  ;;  %v310_v63 = vperm.slane %v216_v33, %v1114_v42 }
  0xbe   :  { %v178_v56 = vpop.xlane.xlu0 %177  ;;  %v223_v30 = vmul.f32 0.00390625, %v181_v47  ;;  %v304_v47 = vsel %vm282_vm2, %v303_v39, %v302_v25  ;;  %v1413_v25 = vlaneseq }
  0xbf   :  { %v222_v59 = vmul.f32 0.00390625, %v178_v56  ;;  %v311_v39 = vsel %vm282_vm2, %v310_v63, %v309_v17 }
  0xc0   :  { %v322_v15 = vperm.slane %v223_v30, %v1100_v8  ;;  %v1189_v35 = vshrl.u32 %v1413_v25, 7 }
  0xc1   :  { %v320_v24 = vperm.slane %v222_v59, %v1103_v3  ;;  %v317_v59 = vperm.slane %v220_v46, %v1114_v42 }
  0xc2   :  { %773 = vset.pattern.permute.xlu2 %v1189_v35  ;;  %v1193_v63 = vadd.s32 16, %v1189_v35 }
  0xc3   :  { %v321_v16 = vsel %vm274_vm0, %v320_v24, %v319_v26  ;;  %v318_v33 = vsel %vm282_vm2, %v317_v59, %v316_v38 }
  0xc4   :  { %v190_v62 = vpop.xlane.xlu1 %189  ;;  %v323_v7 = vsel %vm278_vm1, %v322_v15, %v321_v16  ;;  %775 = vset.pattern.permute.xlu1 %v1193_v63 }
  0xc5   :  { %v184_v48 = vpop.xlane.xlu2 %183  ;;  %v226_v37 = vmul.f32 0.00390625, %v190_v62 }
  0xc6   :  { %v187_v50 = vpop.xlane.xlu0 %186  ;;  %v224_v56 = vmul.f32 0.00390625, %v184_v48 }
  0xc7   :  { %v225_v34 = vmul.f32 0.00390625, %v187_v50  ;;  %v327_v54 = vperm.slane %v226_v37, %v1103_v3  ;;  %v336_v50 = vsel %vm335_vm4, %v297_v36, %v1122_v44  ;;  %v1196_v36 = vadd.s32 8, %v1189_v35 }
  0xc8   :  { %v324_v60 = vperm.slane %v224_v56, %v1114_v42  ;;  %v338_v3 = vsel %vm337_vm5, %v304_v47, %v336_v50  ;;  %v807_v47 = vld [vmem:[%s1332_s4] ss:$0 sm:$0xff]  ;;  %s867_s4 = smov [#allocation5]  }
  0xc9   :  { %v326_v43 = vperm.slane %v225_v34, %v1097_v61  ;;  %v340_v30 = vsel %vm339_vm6, %v311_v39, %v338_v3  ;;  %774 = vset.pattern.permute.xlu0 %v1196_v36  ;;  %s751_s10 = sshll.u32 %s867_s4, 4  ;;  %s752_s10 = int_to_ptr.vmem [resolvable:$true] %s751_s10 }
  0xca   :  { %v325_v46 = vsel %vm282_vm2, %v324_v60, %v323_v7  ;;  %v342_v26 = vsel %vm341_vm7, %v318_v33, %v340_v30  ;;  %v1207_v33 = vadd.s32 24, %v1189_v35 }
  0xcb   :  { %v328_v44 = vsel %vm274_vm0, %v327_v54, %v326_v43  ;;  %v344_v24 = vsel %vm343_vm8, %v325_v46, %v342_v26 }
  0xcc   :  { %v196_v62 = vpop.xlane.xlu1 %195 }
  0xcd   :  { %v228_v48 = vmul.f32 0.00390625, %v196_v62 }
  0xce   :  { %v193_v45 = vpop.xlane.xlu0 %192 }
  0xcf   :  { %v227_v49 = vmul.f32 0.00390625, %v193_v45  ;;  %v331_v51 = vperm.slane %v228_v48, %v1114_v42 }
  0xd1   :  { %v329_v61 = vperm.slane %v227_v49, %v1100_v8  ;;  %v371_v8 = vld [vmem:[%s1331_s3] sm:$0xff] }
  0xd2   :  { %395 = vmatpush.msra.mxu1 %v371_v8 }
  0xd3   :  { %v330_v57 = vsel %vm278_vm1, %v329_v61, %v328_v44 }
  0xd4   :  { %v332_v42 = vsel %vm282_vm2, %v331_v51, %v330_v57 }
  0xd5   :  { %v346_v56 = vsel %vm345_vm9, %v332_v42, %v344_v24 }
  0xd6   :  { %766 = vmatmul.msk.f32.vlgmr.msra.gmra.mxu0 %vm347_vm10, %v346_v56 }
 0x153   :  { %v367_v29 = vpop.f32.mrf.mxu0 }
 0x154   :  { %v368_v37 = vadd.f32 %v806_v52, %v367_v29 }
 0x156   :  { %v370_v34 = vmax.f32 %v368_v37, 0.0 }
 0x158   :  { %767 = vmatmul.msk.f32.vlgmr.msra.gmra.mxu1 %vm376_vm11, %v370_v34 }
 0x1d5   :  { %v397_v59 = vpop.f32.mrf.mxu1 }
 0x1d6   :  { %v398_v15 = vadd.f32 %v807_v47, %v397_v59 }
 0x1d8   :  { %v768_v55 = vmul.f32 -1.442695, %v398_v15 }
 0x1da   :  { %808 = vpow2.f32 %v768_v55 }
 0x1e0   :  { %v809_v53 = vpop.eup %808 }
 0x1e1   :  { %v403_v16 = vadd.f32 1.0, %v809_v53 }
 0x1e3   :  { %810 = vrcp.f32 %v403_v16  ;;  %v415_v54 = vand.u32 2147483648, %v403_v16  ;;  %v413_v45 = vand.u32 2147483647, %v403_v16  ;;  %vm409_vm13 = vweird.f32 %v403_v16 }
 0x1e5   :  { %v416_v50 = vor.u32 1.1754944e-38, %v415_v54  ;;  %vm414_vm15 = vcmp.eq.f32.partialorder %v413_v45, 8.507059e+37  ;;  %v1416_v54 = vld [vmem:[#allocation11_spill] sm:$0xff] }
 0x1e9   :  { %v811_v60 = vpop.eup %810 }
 0x1ea   :  { %v405_v62 = vmul.f32 %v811_v60, %v403_v16  ;;  %vm410_vm12 = vweird.f32 %v811_v60 }
 0x1eb   :  { %vm411_vm14 = vmor %vm409_vm13, %vm410_vm12 }
 0x1ec   :  { %v406_v17 = vsub.f32 1.0, %v405_v62  ;;  %v1414_v62 = vld [vmem:[#allocation24_spill] sm:$0xff] }
 0x1ee   :  { %v407_v43 = vmul.f32 %v811_v60, %v406_v17 }
 0x1f0   :  { %v408_v48 = vadd.f32 %v811_v60, %v407_v43 }
 0x1f2   :  { %v412_v38 = vsel %vm411_vm14, %v811_v60, %v408_v48  ;;  %v1418_v48 = vld [vmem:[#allocation9_spill] sm:$0xff] }
 0x1f3   :  { %v1203_v39 = vsel %vm414_vm15, %v416_v50, %v412_v38  ;;  %v1419_v38 = vld [vmem:[#allocation31_spill] sm:$0xff] }
 0x1f4   :  { %v419_v49 = vperm.slane %v1203_v39, 0  ;;  %v444_v51 = vperm.slane %v1203_v39, 1  ;;  %v469_v7 = vperm.slane %v1203_v39, 2  ;;  %v494_v3 = vperm.slane %v1203_v39, 3 }
 0x1f5   :  { %v519_v61 = vperm.slane %v1203_v39, 4  ;;  %v1226_v46 = vperm.slane %v1203_v39, 5  ;;  %v1233_v44 = vperm.slane %v1203_v39, 7 }
 0x1f6   :  { %436 = vperm.xlu1 %775, %v419_v49   ;;  %430 = vperm.xlu0 %774, %v419_v49  }
 0x1f7   :  { %424 = vperm.xlu2 %773, %v419_v49  }
 0x1fe   :  { %778 = vset.pattern.permute.xlu1 %v1196_v36  ;;  %781 = vset.pattern.permute.xlu0 %v1189_v35 }
 0x1ff   :  { %776 = vset.pattern.permute.xlu2 %v1207_v33 }
 0x206   :  { %455 = vperm.xlu1 %778, %v444_v51   ;;  %474 = vperm.xlu0 %781, %v469_v7  }
 0x207   :  { %442 = vperm.xlu2 %776, %v419_v49   ;;  %v1420_v49 = vld [vmem:[#allocation32_spill] sm:$0xff] }
 0x20e   :  { %780 = vset.pattern.permute.xlu1 %v1207_v33  ;;  %786 = vset.pattern.permute.xlu0 %v1196_v36 }
 0x20f   :  { %777 = vset.pattern.permute.xlu2 %v1189_v35 }
 0x216   :  { %467 = vperm.xlu1 %780, %v444_v51   ;;  %505 = vperm.xlu0 %786, %v494_v3  }
 0x217   :  { %449 = vperm.xlu2 %777, %v444_v51  }
 0x21e   :  { %783 = vset.pattern.permute.xlu1 %v1193_v63  ;;  %791 = vset.pattern.permute.xlu0 %v1193_v63 }
 0x21f   :  { %779 = vset.pattern.permute.xlu2 %v1193_v63 }
 0x226   :  { %486 = vperm.xlu1 %783, %v469_v7   ;;  %536 = vperm.xlu0 %791, %v519_v61  }
 0x227   :  { %461 = vperm.xlu2 %779, %v444_v51  }
 0x22e   :  { %785 = vset.pattern.permute.xlu1 %v1189_v35  ;;  %796 = vset.pattern.permute.xlu0 %v1207_v33 }
 0x22f   :  { %782 = vset.pattern.permute.xlu2 %v1196_v36 }
 0x236   :  { %499 = vperm.xlu1 %785, %v494_v3   ;;  %567 = vperm.xlu0 %796, %v1226_v46  }
 0x237   :  { %480 = vperm.xlu2 %782, %v469_v7  }
 0x23e   :  { %788 = vset.pattern.permute.xlu1 %v1207_v33  ;;  %801 = vset.pattern.permute.xlu0 %v1189_v35 }
 0x23f   :  { %784 = vset.pattern.permute.xlu2 %v1207_v33 }
 0x246   :  { %517 = vperm.xlu1 %788, %v494_v3   ;;  %599 = vperm.xlu0 %801, %v1233_v44  }
 0x247   :  { %492 = vperm.xlu2 %784, %v469_v7   ;;  %v1421_v7 = vld [vmem:[#allocation12_spill] sm:$0xff] }
 0x24e   :  { %790 = vset.pattern.permute.xlu1 %v1196_v36  ;;  %805 = vset.pattern.permute.xlu0 %v1207_v33 }
 0x24f   :  { %787 = vset.pattern.permute.xlu2 %v1193_v63 }
 0x251   :  { %v425_v30 = vpop.permute.xlu2 %424 }
 0x252   :  { %v619_v57 = vmul.f32 %v425_v30, %v914_v5  ;;  %v620_v26 = vmul.f32 %v425_v30, %v916_v6 }
 0x254   :  { %683 = vst [vmem:[#allocation5] sm:$0xff] %v619_v57 }
 0x255   :  { %684 = vst [vmem:[#allocation5 + $0x8] sm:$0xff] %v620_v26  ;;  %v1423_v26 = vld [vmem:[#allocation16_spill] sm:$0xff] }
 0x256   :  { %530 = vperm.xlu1 %790, %v519_v61  }
 0x257   :  { %511 = vperm.xlu2 %787, %v494_v3  }
 0x25e   :  { %793 = vset.pattern.permute.xlu1 %v1189_v35 }
 0x25f   :  { %789 = vset.pattern.permute.xlu2 %v1189_v35 }
 0x261   :  { %v443_v42 = vpop.permute.xlu2 %442 }
 0x262   :  { %v625_v24 = vmul.f32 %v443_v42, %v944_v20  ;;  %v626_v56 = vmul.f32 %v443_v42, %v946_v21 }
 0x264   :  { %689 = vst [vmem:[#allocation5 + $0x30] sm:$0xff] %v625_v24  ;;  %v1424_v24 = vld [vmem:[#allocation17_spill] sm:$0xff] }
 0x265   :  { %690 = vst [vmem:[#allocation5 + $0x38] sm:$0xff] %v626_v56 }
 0x266   :  { %549 = vperm.xlu1 %793, %v1226_v46  }
 0x267   :  { %524 = vperm.xlu2 %789, %v519_v61  }
 0x268   :  { %v437_v5 = vpop.permute.xlu1 %436  ;;  %v431_v6 = vpop.permute.xlu0 %430 }
 0x269   :  { %v623_v8 = vmul.f32 %v437_v5, %v908_v2  ;;  %v624_v52 = vmul.f32 %v437_v5, %v912_v4  ;;  %v621_v29 = vmul.f32 %v431_v6, %v930_v13  ;;  %v622_v37 = vmul.f32 %v431_v6, %v932_v14  ;;  %v1425_v5 = vld [vmem:[#allocation41_spill] sm:$0xff] }
 0x26b   :  { %687 = vst [vmem:[#allocation5 + $0x20] sm:$0xff] %v623_v8  ;;  %v1426_v8 = vld [vmem:[#allocation42_spill] sm:$0xff] }
 0x26c   :  { %688 = vst [vmem:[#allocation5 + $0x28] sm:$0xff] %v624_v52 }
 0x26d   :  { %685 = vst [vmem:[#allocation5 + $0x10] sm:$0xff] %v621_v29  ;;  %v1427_v29 = vld [vmem:[#allocation18_spill] sm:$0xff] }
 0x26e   :  { %686 = vst [vmem:[#allocation5 + $0x18] sm:$0xff] %v622_v37  ;;  %795 = vset.pattern.permute.xlu1 %v1193_v63 }
 0x26f   :  { %792 = vset.pattern.permute.xlu2 %v1207_v33 }
 0x271   :  { %v450_v20 = vpop.permute.xlu2 %449 }
 0x272   :  { %v627_v21 = vmul.f32 %v450_v20, %v904_v0  ;;  %v628_v34 = vmul.f32 %v450_v20, %v906_v1  ;;  %v1428_v20 = vld [vmem:[#allocation19_spill] sm:$0xff] }
 0x274   :  { %691 = vst [vmem:[#allocation5 + $0x40] sm:$0xff] %v627_v21 }
 0x275   :  { %692 = vst [vmem:[#allocation5 + $0x48] sm:$0xff] %v628_v34 }
 0x276   :  { %561 = vperm.xlu1 %795, %v1226_v46  }
 0x277   :  { %542 = vperm.xlu2 %792, %v519_v61   ;;  %v1422_v61 = vld [vmem:[#allocation13_spill] sm:$0xff] }
 0x278   :  { %v456_v2 = vpop.permute.xlu1 %455  ;;  %v475_v4 = vpop.permute.xlu0 %474 }
 0x279   :  { %v629_v13 = vmul.f32 %v456_v2, %v922_v9  ;;  %v630_v14 = vmul.f32 %v456_v2, %v924_v10  ;;  %v635_v25 = vmul.f32 %v475_v4, %v948_v22  ;;  %v636_v47 = vmul.f32 %v475_v4, %v950_v23  ;;  %v1429_v2 = vld [vmem:[#allocation14_spill] sm:$0xff] }
 0x27a   :  { %v569_v9 = vperm.slane %v1203_v39, 6 }
 0x27b   :  { %693 = vst [vmem:[#allocation5 + $0x50] sm:$0xff] %v629_v13  ;;  %v1430_v13 = vld [vmem:[#allocation15_spill] sm:$0xff] }
 0x27c   :  { %694 = vst [vmem:[#allocation5 + $0x58] sm:$0xff] %v630_v14 }
 0x27d   :  { %699 = vst [vmem:[#allocation5 + $0x80] sm:$0xff] %v635_v25 }
 0x27e   :  { %700 = vst [vmem:[#allocation5 + $0x88] sm:$0xff] %v636_v47  ;;  %798 = vset.pattern.permute.xlu1 %v1196_v36  ;;  %v1431_v47 = vld [vmem:[#allocation29_spill] sm:$0xff] }
 0x27f   :  { %794 = vset.pattern.permute.xlu2 %v1196_v36 }
 0x281   :  { %v462_v0 = vpop.permute.xlu2 %461 }
 0x282   :  { %v631_v1 = vmul.f32 %v462_v0, %v926_v11  ;;  %v632_v59 = vmul.f32 %v462_v0, %v928_v12 }
 0x284   :  { %695 = vst [vmem:[#allocation5 + $0x60] sm:$0xff] %v631_v1 }
 0x285   :  { %696 = vst [vmem:[#allocation5 + $0x68] sm:$0xff] %v632_v59 }
 0x286   :  { %580 = vperm.xlu1 %798, %v569_v9  }
 0x287   :  { %555 = vperm.xlu2 %794, %v1226_v46  }
 0x288   :  { %v468_v10 = vpop.permute.xlu1 %467  ;;  %v506_v22 = vpop.permute.xlu0 %505 }
 0x289   :  { %v633_v23 = vmul.f32 %v468_v10, %v966_v31  ;;  %v634_v15 = vmul.f32 %v468_v10, %v968_v32  ;;  %v645_v55 = vmul.f32 %v506_v22, %v984_v40  ;;  %v646_v53 = vmul.f32 %v506_v22, %v986_v41  ;;  %v1434_v22 = vld [vmem:[#allocation21_spill] sm:$0xff] }
 0x28b   :  { %697 = vst [vmem:[#allocation5 + $0x70] sm:$0xff] %v633_v23 }
 0x28c   :  { %698 = vst [vmem:[#allocation5 + $0x78] sm:$0xff] %v634_v15  ;;  %v1435_v15 = vld [vmem:[#allocation22_spill] sm:$0xff] }
 0x28d   :  { %709 = vst [vmem:[#allocation5 + $0xd0] sm:$0xff] %v645_v55 }
 0x28e   :  { %710 = vst [vmem:[#allocation5 + $0xd8] sm:$0xff] %v646_v53  ;;  %800 = vset.pattern.permute.xlu1 %v1207_v33  ;;  %v1436_v53 = vld [vmem:[#allocation23_spill] sm:$0xff] }
 0x28f   :  { %797 = vset.pattern.permute.xlu2 %v1189_v35 }
 0x291   :  { %v481_v11 = vpop.permute.xlu2 %480 }
 0x292   :  { %v637_v12 = vmul.f32 %v481_v11, %v940_v18  ;;  %v638_v16 = vmul.f32 %v481_v11, %v942_v19  ;;  %v1415_v19 = vld [vmem:[#allocation10_spill] sm:$0xff] }
 0x294   :  { %701 = vst [vmem:[#allocation5 + $0x90] sm:$0xff] %v637_v12 }
 0x295   :  { %702 = vst [vmem:[#allocation5 + $0x98] sm:$0xff] %v638_v16  ;;  %v1437_v16 = vld [vmem:[#allocation25_spill] sm:$0xff] }
 0x296   :  { %592 = vperm.xlu1 %800, %v569_v9  }
 0x297   :  { %574 = vperm.xlu2 %797, %v569_v9  }
 0x298   :  { %v487_v31 = vpop.permute.xlu1 %486  ;;  %v537_v32 = vpop.permute.xlu0 %536 }
 0x299   :  { %v639_v40 = vmul.f32 %v487_v31, %v958_v27  ;;  %v640_v41 = vmul.f32 %v487_v31, %v960_v28  ;;  %v655_v60 = vmul.f32 %v537_v32, %v1020_v58  ;;  %v656_v17 = vmul.f32 %v537_v32, %v1414_v62  ;;  %v1417_v58 = vld [vmem:[#allocation8_spill] sm:$0xff]  ;;  %v1438_v32 = vld [vmem:[#allocation26_spill] sm:$0xff] }
 0x29b   :  { %703 = vst [vmem:[#allocation5 + $0xa0] sm:$0xff] %v639_v40 }
 0x29c   :  { %704 = vst [vmem:[#allocation5 + $0xa8] sm:$0xff] %v640_v41 }
 0x29d   :  { %719 = vst [vmem:[#allocation5 + $0x120] sm:$0xff] %v655_v60  ;;  %v1439_v60 = vld [vmem:[#allocation27_spill] sm:$0xff] }
 0x29e   :  { %720 = vst [vmem:[#allocation5 + $0x128] sm:$0xff] %v656_v17  ;;  %803 = vset.pattern.permute.xlu1 %v1193_v63  ;;  %v1440_v17 = vld [vmem:[#allocation28_spill] sm:$0xff] }
 0x29f   :  { %799 = vset.pattern.permute.xlu2 %v1193_v63 }
 0x2a1   :  { %v493_v18 = vpop.permute.xlu2 %492 }
 0x2a2   :  { %v641_v35 = vmul.f32 %v493_v18, %v1415_v19  ;;  %v642_v43 = vmul.f32 %v493_v18, %v1416_v54 }
 0x2a4   :  { %705 = vst [vmem:[#allocation5 + $0xb0] sm:$0xff] %v641_v35  ;;  %v1441_v35 = vld [vmem:[#allocation35_spill] sm:$0xff] }
 0x2a5   :  { %706 = vst [vmem:[#allocation5 + $0xb8] sm:$0xff] %v642_v43  ;;  %v1442_v43 = vld [vmem:[#allocation36_spill] sm:$0xff] }
 0x2a6   :  { %611 = vperm.xlu1 %803, %v1233_v44  }
 0x2a7   :  { %586 = vperm.xlu2 %799, %v569_v9   ;;  %v1433_v9 = vld [vmem:[#allocation20_spill] sm:$0xff] }
 0x2a8   :  { %v500_v27 = vpop.permute.xlu1 %499  ;;  %v568_v28 = vpop.permute.xlu0 %567 }
 0x2a9   :  { %v643_v45 = vmul.f32 %v500_v27, %v1417_v58  ;;  %v644_v50 = vmul.f32 %v500_v27, %v1418_v48  ;;  %v665_v39 = vmul.f32 %v568_v28, %v1419_v38  ;;  %v666_v63 = vmul.f32 %v568_v28, %v1420_v49  ;;  %v1443_v58 = vld [vmem:[#allocation33_spill] sm:$0xff]  ;;  %v1444_v48 = vld [vmem:[#allocation34_spill] sm:$0xff] }
 0x2ab   :  { %707 = vst [vmem:[#allocation5 + $0xc0] sm:$0xff] %v643_v45 }
 0x2ac   :  { %708 = vst [vmem:[#allocation5 + $0xc8] sm:$0xff] %v644_v50 }
 0x2ad   :  { %729 = vst [vmem:[#allocation5 + $0x170] sm:$0xff] %v665_v39  ;;  %v1445_v39 = vld [vmem:[#allocation39_spill] sm:$0xff] }
 0x2ae   :  { %730 = vst [vmem:[#allocation5 + $0x178] sm:$0xff] %v666_v63  ;;  %v1446_v63 = vld [vmem:[#allocation40_spill] sm:$0xff] }
 0x2af   :  { %802 = vset.pattern.permute.xlu2 %v1196_v36 }
 0x2b1   :  { %v512_v51 = vpop.permute.xlu2 %511 }
 0x2b2   :  { %v647_v3 = vmul.f32 %v512_v51, %v1421_v7  ;;  %v648_v46 = vmul.f32 %v512_v51, %v1422_v61 }
 0x2b4   :  { %711 = vst [vmem:[#allocation5 + $0xe0] sm:$0xff] %v647_v3  ;;  %v1447_v3 = vld [vmem:[#allocation37_spill] sm:$0xff] }
 0x2b5   :  { %712 = vst [vmem:[#allocation5 + $0xe8] sm:$0xff] %v648_v46  ;;  %v1448_v46 = vld [vmem:[#allocation38_spill] sm:$0xff] }
 0x2b7   :  { %605 = vperm.xlu2 %802, %v1233_v44  }
 0x2b8   :  { %v518_v30 = vpop.permute.xlu1 %517  ;;  %v600_v57 = vpop.permute.xlu0 %599 }
 0x2b9   :  { %v649_v42 = vmul.f32 %v518_v30, %v1423_v26  ;;  %v650_v56 = vmul.f32 %v518_v30, %v1424_v24  ;;  %v675_v6 = vmul.f32 %v600_v57, %v1425_v5  ;;  %v676_v52 = vmul.f32 %v600_v57, %v1426_v8  ;;  %v1449_v26 = vld [vmem:[#allocation45_spill] sm:$0xff]  ;;  %v1450_v24 = vld [vmem:[#allocation46_spill] sm:$0xff] }
 0x2bb   :  { %713 = vst [vmem:[#allocation5 + $0xf0] sm:$0xff] %v649_v42 }
 0x2bc   :  { %714 = vst [vmem:[#allocation5 + $0xf8] sm:$0xff] %v650_v56 }
 0x2bd   :  { %739 = vst [vmem:[#allocation5 + $0x1c0] sm:$0xff] %v675_v6  ;;  %v1451_v6 = vld [vmem:[#allocation43_spill] sm:$0xff] }
 0x2be   :  { %740 = vst [vmem:[#allocation5 + $0x1c8] sm:$0xff] %v676_v52  ;;  %v1452_v52 = vld [vmem:[#allocation44_spill] sm:$0xff] }
 0x2bf   :  { %804 = vset.pattern.permute.xlu2 %v1207_v33  ;;  %v1432_v33 = vld [vmem:[#allocation30_spill] sm:$0xff] }
 0x2c1   :  { %v525_v36 = vpop.permute.xlu2 %524 }
 0x2c2   :  { %v651_v37 = vmul.f32 %v525_v36, %v1427_v29  ;;  %v652_v21 = vmul.f32 %v525_v36, %v1428_v20 }
 0x2c4   :  { %715 = vst [vmem:[#allocation5 + $0x100] sm:$0xff] %v651_v37 }
 0x2c5   :  { %716 = vst [vmem:[#allocation5 + $0x108] sm:$0xff] %v652_v21 }
 0x2c7   :  { %617 = vperm.xlu2 %804, %v1233_v44  }
 0x2c8   :  { %v531_v34 = vpop.permute.xlu1 %530 }
 0x2c9   :  { %v653_v4 = vmul.f32 %v531_v34, %v1429_v2  ;;  %v654_v14 = vmul.f32 %v531_v34, %v1430_v13 }
 0x2cb   :  { %717 = vst [vmem:[#allocation5 + $0x110] sm:$0xff] %v653_v4 }
 0x2cc   :  { %718 = vst [vmem:[#allocation5 + $0x118] sm:$0xff] %v654_v14 }
 0x2d1   :  { %v543_v25 = vpop.permute.xlu2 %542 }
 0x2d2   :  { %v657_v0 = vmul.f32 %v543_v25, %v1431_v47  ;;  %v658_v1 = vmul.f32 %v543_v25, %v1432_v33 }
 0x2d4   :  { %721 = vst [vmem:[#allocation5 + $0x130] sm:$0xff] %v657_v0 }
 0x2d5   :  { %722 = vst [vmem:[#allocation5 + $0x138] sm:$0xff] %v658_v1 }
 0x2d8   :  { %v550_v59 = vpop.permute.xlu1 %549 }
 0x2d9   :  { %v659_v10 = vmul.f32 %v550_v59, %v1433_v9  ;;  %v660_v23 = vmul.f32 %v550_v59, %v1434_v22 }
 0x2db   :  { %723 = vst [vmem:[#allocation5 + $0x140] sm:$0xff] %v659_v10 }
 0x2dc   :  { %724 = vst [vmem:[#allocation5 + $0x148] sm:$0xff] %v660_v23 }
 0x2e1   :  { %v556_v44 = vpop.permute.xlu2 %555 }
 0x2e2   :  { %v661_v55 = vmul.f32 %v556_v44, %v1435_v15  ;;  %v662_v11 = vmul.f32 %v556_v44, %v1436_v53 }
 0x2e4   :  { %725 = vst [vmem:[#allocation5 + $0x150] sm:$0xff] %v661_v55 }
 0x2e5   :  { %726 = vst [vmem:[#allocation5 + $0x158] sm:$0xff] %v662_v11 }
 0x2e8   :  { %v562_v12 = vpop.permute.xlu1 %561 }
 0x2e9   :  { %v663_v31 = vmul.f32 %v562_v12, %v1437_v16  ;;  %v664_v40 = vmul.f32 %v562_v12, %v1438_v32 }
 0x2eb   :  { %727 = vst [vmem:[#allocation5 + $0x160] sm:$0xff] %v663_v31 }
 0x2ec   :  { %728 = vst [vmem:[#allocation5 + $0x168] sm:$0xff] %v664_v40 }
 0x2f1   :  { %v575_v41 = vpop.permute.xlu2 %574 }
 0x2f2   :  { %v667_v62 = vmul.f32 %v575_v41, %v1439_v60  ;;  %v668_v18 = vmul.f32 %v575_v41, %v1440_v17 }
 0x2f4   :  { %731 = vst [vmem:[#allocation5 + $0x180] sm:$0xff] %v667_v62 }
 0x2f5   :  { %732 = vst [vmem:[#allocation5 + $0x188] sm:$0xff] %v668_v18 }
 0x2f8   :  { %v581_v19 = vpop.permute.xlu1 %580 }
 0x2f9   :  { %v669_v54 = vmul.f32 %v581_v19, %v1441_v35  ;;  %v670_v27 = vmul.f32 %v581_v19, %v1442_v43 }
 0x2fb   :  { %733 = vst [vmem:[#allocation5 + $0x190] sm:$0xff] %v669_v54 }
 0x2fc   :  { %734 = vst [vmem:[#allocation5 + $0x198] sm:$0xff] %v670_v27 }
 0x301   :  { %v587_v28 = vpop.permute.xlu2 %586 }
 0x302   :  { %v671_v45 = vmul.f32 %v587_v28, %v1443_v58  ;;  %v672_v50 = vmul.f32 %v587_v28, %v1444_v48 }
 0x304   :  { %735 = vst [vmem:[#allocation5 + $0x1a0] sm:$0xff] %v671_v45 }
 0x305   :  { %736 = vst [vmem:[#allocation5 + $0x1a8] sm:$0xff] %v672_v50 }
 0x308   :  { %v593_v38 = vpop.permute.xlu1 %592 }
 0x309   :  { %v673_v49 = vmul.f32 %v593_v38, %v1445_v39  ;;  %v674_v51 = vmul.f32 %v593_v38, %v1446_v63 }
 0x30b   :  { %737 = vst [vmem:[#allocation5 + $0x1b0] sm:$0xff] %v673_v49 }
 0x30c   :  { %738 = vst [vmem:[#allocation5 + $0x1b8] sm:$0xff] %v674_v51 }
 0x311   :  { %v606_v7 = vpop.permute.xlu2 %605 }
 0x312   :  { %v677_v61 = vmul.f32 %v606_v7, %v1447_v3  ;;  %v678_v30 = vmul.f32 %v606_v7, %v1448_v46 }
 0x314   :  { %741 = vst [vmem:[#allocation5 + $0x1d0] sm:$0xff] %v677_v61 }
 0x315   :  { %742 = vst [vmem:[#allocation5 + $0x1d8] sm:$0xff] %v678_v30 }
 0x318   :  { %v612_v57 = vpop.permute.xlu1 %611 }
 0x319   :  { %v679_v42 = vmul.f32 %v612_v57, %v1449_v26  ;;  %v680_v56 = vmul.f32 %v612_v57, %v1450_v24 }
 0x31b   :  { %743 = vst [vmem:[#allocation5 + $0x1e0] sm:$0xff] %v679_v42 }
 0x31c   :  { %744 = vst [vmem:[#allocation5 + $0x1e8] sm:$0xff] %v680_v56 }
 0x321   :  { %v618_v5 = vpop.permute.xlu2 %617 }
 0x322   :  { %v681_v8 = vmul.f32 %v618_v5, %v1451_v6  ;;  %v682_v36 = vmul.f32 %v618_v5, %v1452_v52 }
 0x324   :  { %745 = vst [vmem:[#allocation5 + $0x1f0] sm:$0xff] %v681_v8 }
 0x325   :  { %746 = vst [vmem:[#allocation5 + $0x1f8] sm:$0xff] %v682_v36 }
 0x326   :  { %759 = dma.vmem_to_hbm [thread:$0]  %s752_s10, 8192, %s754_s13, [#allocation4], %s865_s23, %s865_s23, %s866_s24  }
 0x327   :  { %862 = dma.done.wait [#allocation4], 8192  }
 0x328   :  { %863 = vsyncadd [#allocation4], 4294959104 }
 0x329   :  { %764 = vsyncpa [#allocation3], 1 }
 0x32a   :  { %765 = vsyncpa [#allocation4], 1 }

</bundles_post_ra>
